<compile_context>
chip_gen: v5e
topology: v5e:2x2
jax: 0.10.0
libtpu: 0.0.40
codegen_flags: <defaults>
</compile_context>

<pallas_src>
import jax
import jax.numpy as jnp
from jax.experimental import pallas as pl
from jax.experimental.pallas import tpu as pltpu


def _conv_relu_mul_kernel(p_ref, w_ref, o_ref):
    # p_ref: (K_aug, TS)  transposed im2col patches (last row = ones for bias fold)
    # w_ref: (C_out, K_aug) weights with bias appended as the last column
    # o_ref: (C_out, TS)  lane-dense output tile: v1 * relu(v1)
    v1 = jnp.dot(w_ref[...], p_ref[...], preferred_element_type=jnp.float32)
    o_ref[...] = (v1 * jnp.maximum(v1, 0.0)).astype(o_ref.dtype)


def _im2col_t(x, kh, kw, stride, pad):
    """(N, C, H, W) -> (N, C*kh*kw, Ho*Wo): K-major patches, spatial on last dim."""
    N, C, H, W = x.shape
    xp = jnp.pad(x, ((0, 0), (0, 0), (pad, pad), (pad, pad)))
    Ho = (H + 2 * pad - kh) // stride + 1
    Wo = (W + 2 * pad - kw) // stride + 1
    taps = []
    for i in range(kh):
        for j in range(kw):
            taps.append(xp[:, :, i:i + stride * Ho:stride, j:j + stride * Wo:stride])
    col = jnp.stack(taps, axis=2)                  # (N, C, kh*kw, Ho, Wo)
    col = col.reshape(N, C * kh * kw, Ho * Wo)     # (N, K, S), K ordered (C, kh, kw)
    return col, Ho, Wo


def _pick_spatial_tile(S):
    # Prefer a multiple of 128 (lane-dense, unmasked stores); fall back to full S.
    for cand in (1024, 512, 256, 128):
        if S % cand == 0:
            return cand
    return S


def model_forward(x, weight, bias):
    """x: (N, 4, H, W); weight: (3, 4, 3, 3); bias: (3,) -> (N, 3, Ho, Wo)."""
    kh, kw, stride, pad = 3, 3, 2, 1
    C_out = weight.shape[0]
    N, C_in = x.shape[0], x.shape[1]
    K = C_in * kh * kw

    patches, Ho, Wo = _im2col_t(x, kh, kw, stride, pad)          # (N, K, S)
    S = Ho * Wo

    # Fold bias: ones row appended to patches, bias column appended to weights.
    patches = jnp.concatenate(
        [patches, jnp.ones((N, 1, S), patches.dtype)], axis=1)   # (N, K+1, S)
    w_aug = jnp.concatenate(
        [weight.reshape(C_out, K), bias.reshape(C_out, 1)], axis=1)  # (C_out, K+1)
    K_aug = K + 1

    TS = _pick_spatial_tile(S)

    out = pl.pallas_call(
        _conv_relu_mul_kernel,
        out_shape=jax.ShapeDtypeStruct((N, C_out, S), jnp.float32),
        grid=(N, S // TS),
        in_specs=[
            pl.BlockSpec((None, K_aug, TS), lambda n, s: (n, 0, s)),
            pl.BlockSpec((C_out, K_aug), lambda n, s: (0, 0)),
        ],
        out_specs=pl.BlockSpec((None, C_out, TS), lambda n, s: (n, 0, s)),
        compiler_params=pltpu.CompilerParams(
            dimension_semantics=("parallel", "parallel"),
            vmem_limit_bytes=32 * 1024 * 1024,
        ),
    )(patches, w_aug)

    # (N, C_out, S) -> NCHW is a pure reshape (no transpose / extra HBM pass).
    return out.reshape(N, C_out, Ho, Wo)


if __name__ == "__main__":
    # Deterministic params (shapes from Conv2d(4, 3, (3,3), stride=2, pad=1)).
    key = jax.random.PRNGKey(0)
    kx, kw_, kb = jax.random.split(key, 3)

    N, C_in, H, W = 2, 4, 16, 16
    C_out, KH, KW = 3, 3, 3

    x = jax.random.normal(kx, (N, C_in, H, W), dtype=jnp.float32)
    fan_in = C_in * KH * KW
    bound = 1.0 / (fan_in ** 0.5)
    weight = jax.random.uniform(kw_, (C_out, C_in, KH, KW), jnp.float32,
                                minval=-bound, maxval=bound)
    bias = jax.random.uniform(kb, (C_out,), jnp.float32,
                              minval=-bound, maxval=bound)

    # TODO(synk): the original module calls self.relu which is never defined in
    # __init__ (would raise AttributeError in PyTorch); implemented as F.relu.
    out = model_forward(x, weight, bias)
    jax.block_until_ready(out)

    # Cross-check against a pure-JAX reference (lax conv) for correctness.
    ref_v1 = jax.lax.conv_general_dilated(
        x, weight, window_strides=(2, 2), padding=((1, 1), (1, 1)),
        dimension_numbers=("NCHW", "OIHW", "NCHW"))
    ref_v1 = ref_v1 + bias.reshape(1, C_out, 1, 1)
    ref = ref_v1 * jnp.maximum(ref_v1, 0.0)
    assert out.shape == (N, C_out, H // 2, W // 2)
    assert jnp.allclose(out, ref, atol=1e-4, rtol=1e-4)

    print("KERNEL_OK")
</pallas_src>

<mosaic_0001>
module attributes {stable_mosaic.version = 11 : i64} {
  func.func @_conv_relu_mul_kernel(%arg0: i32, %arg1: i32, %arg2: memref<1x37x64xf32, #tpu.memory_space<vmem>>, %arg3: memref<3x37xf32, #tpu.memory_space<vmem>>, %arg4: memref<1x3x64xf32, #tpu.memory_space<vmem>>) attributes {dimension_semantics = [#tpu.dimension_semantics<parallel>, #tpu.dimension_semantics<parallel>], iteration_bounds = array<i64: 2, 1>, scalar_prefetch = 0 : i64, scratch_operands = 0 : i64, tpu.core_type = #tpu.core_type<tc>, window_params = [{transform_indices = @transform_0, window_bounds = array<i64: 1, 37, 64>}, {pipeline_mode = #tpu.pipeline_mode<synchronous>, transform_indices = @transform_1, window_bounds = array<i64: 3, 37>}, {transform_indices = @transform_2, window_bounds = array<i64: 1, 3, 64>}]} {
    %c0 = arith.constant 0 : index
    %c0_0 = arith.constant 0 : index
    %0 = vector.load %arg3[%c0, %c0_0] : memref<3x37xf32, #tpu.memory_space<vmem>>, vector<3x37xf32>
    %c0_1 = arith.constant 0 : index
    %c0_2 = arith.constant 0 : index
    %c0_3 = arith.constant 0 : index
    %1 = vector.load %arg2[%c0_1, %c0_2, %c0_3] : memref<1x37x64xf32, #tpu.memory_space<vmem>>, vector<1x37x64xf32>
    %2 = vector.shape_cast %1 : vector<1x37x64xf32> to vector<37x64xf32>
    %cst = arith.constant dense<0.000000e+00> : vector<3x64xf32>
    %3 = tpu.matmul %0, %2, %cst {dimension_numbers = #tpu.dot_dimension_numbers<[1], [0], [0], [1], [0, 0, 1, 1], [], []>} : vector<3x37xf32>, vector<37x64xf32>, vector<3x64xf32> -> vector<3x64xf32>
    %cst_4 = arith.constant 0.000000e+00 : f32
    %4 = vector.broadcast %cst_4 : f32 to vector<3x64xf32>
    %5 = arith.maximumf %3, %4 : vector<3x64xf32>
    %6 = arith.mulf %3, %5 : vector<3x64xf32>
    %c0_5 = arith.constant 0 : index
    %c0_6 = arith.constant 0 : index
    %c0_7 = arith.constant 0 : index
    %7 = vector.load %arg4[%c0_5, %c0_6, %c0_7] : memref<1x3x64xf32, #tpu.memory_space<vmem>>, vector<1x3x64xf32>
    %8 = vector.shape_cast %7 : vector<1x3x64xf32> to vector<3x64xf32>
    %9 = vector.shape_cast %6 : vector<3x64xf32> to vector<1x3x64xf32>
    tpu.vector_store %arg4[%c0_5, %c0_6, %c0_7], %9 {strides = array<i32>} : memref<1x3x64xf32, #tpu.memory_space<vmem>>, vector<1x3x64xf32>,
    return
  }
  func.func @transform_0(%arg0: i32, %arg1: i32) -> (i32, i32, i32) {
    %c0_i32 = arith.constant 0 : i32
    %c0_i32_0 = arith.constant 0 : i32
    return %arg0, %c0_i32, %arg1 : i32, i32, i32
  }
  func.func @transform_1(%arg0: i32, %arg1: i32) -> (i32, i32) {
    %c0_i32 = arith.constant 0 : i32
    %c0_i32_0 = arith.constant 0 : i32
    %c0_i32_1 = arith.constant 0 : i32
    return %c0_i32, %c0_i32_0 : i32, i32
  }
  func.func @transform_2(%arg0: i32, %arg1: i32) -> (i32, i32, i32) {
    %c0_i32 = arith.constant 0 : i32
    %c0_i32_0 = arith.constant 0 : i32
    return %arg0, %c0_i32, %arg1 : i32, i32, i32
  }
}

</mosaic_0001>

<bundles_post_ra>
// kernel: tpu_custom_call.1
= control target key start
LH: loop header
LB: loop body
LE: loop exit
PB: predicated region body
PF: predicated region fallthrough
CT: control target
= control target key end

     0   :  { %s363_s9 = smov 0   ;;  %s365_s10 = smov 0   ;;  %s399_s0 = inlined_call_operand.vmem [shape: f32[2,37,64], index: 0, kind: input, shape index: {}]   ;;  %s400_s1 = inlined_call_operand.vmem [shape: f32[3,37], index: 1, kind: input, shape index: {}]   ;;  %s401_s2 = inlined_call_operand.vmem [shape: f32[2,3,64], index: 2, kind: output, shape index: {}]  }
   0x1   :  { %s367_s11 = smov 0  }
   0x2 LB: > { %s24_s12 = sadd.s32 1, %s342_s10  ;;  %p292_p0 = scmp.ge.s32.totalorder %s346_s11, 1  ;;  %s346_s11 = sphi %s367_s11, %s12_s11   ;;  %s342_s10 = sphi %s365_s10, %s403_s10   ;;  %s338_s9 = sphi %s363_s9, %s402_s9  }
   0x3   : > { %p26_p1 = scmp.ge.s32.totalorder %s24_s12, 2  ;;  %p131_p2 = scmp.lt.s32.totalorder %s346_s11, 3 }
   0x5   : > { %s405_s12 = smov (%p26_p1, %s24_s12), 0  ;;  %p132_p3 = pnand %p292_p0, %p131_p2 }
   0x6   : > { %p158_p4 = scmp.lt.s32.totalorder (!%p132_p3), %s338_s9, 1 }
   0x7   : > { %135 = sbr.rel (%p132_p3) target bundleno = 157 (0x9d), region = 28 }
   0xc   : > { %s407_s9 = smov (!%p158_p4, %s338_s9), 1  ;;  %vm183_vm0 = vcmask 1044480   ;;  %v173_v5 = vld [vmem:[%s400_s1] sm:$0x7]  ;;  %vm179_vm1 = vcmask 302080   ;;  %vm209_vm2 = vcmask 518144  }
   0xd   : > { %s299_s13 = smul.u32 40, %s407_s9  ;;  %s294_s19 = sshll.u32 %s407_s9, 2 }
   0xe   : > { %s172_s22 = scalar_lea.vmem %s401_s2, %s294_s19 }
   0xf   : > { %s165_s16 = scalar_lea.vmem %s399_s0, %s299_s13 }
  0x10   : > { %v178_v0 = vld [vmem:[%s165_s16 + $0x20] sm:$0x1f]  ;;  %v177_v1 = vld [vmem:[%s165_s16 + $0x18] sm:$0xff]  ;;  %v176_v2 = vld [vmem:[%s165_s16 + $0x10] sm:$0xff] }
  0x11   : > { %295 = vmatpush.msk.msra.mxu0 %vm183_vm0, %v178_v0  ;;  %v175_v3 = vld [vmem:[%s165_s16 + $0x8] sm:$0xff]  ;;  %v174_v4 = vld [vmem:[%s165_s16] sm:$0xff] }
  0x13   : > { %199 = vmatpush.msra.mxu0 %v177_v1 }
  0x15   : > { %200 = vmatpush.msra.mxu0 %v176_v2 }
  0x17   : > { %201 = vmatpush.msra.mxu0 %v175_v3 }
  0x19   : > { %202 = vmatpush.msra.mxu0 %v174_v4 }
  0x1a   : > { %296 = vmatmul.msk.f32.vlgmr.msra.gmra.mxu0 %vm179_vm1, %v173_v5 }
  0x97   : > { %v204_v6 = vpop.f32.mrf.mxu0 }
  0x98   : > { %v207_v7 = vmax.f32 %v204_v6, 0.0 }
  0x9a   : > { %v208_v8 = vmul.f32 %v207_v7, %v204_v6 }
  0x9c   : > { %210 = vst.msk [vmem:[%s172_s22] sm:$0x7] %vm209_vm2, %v208_v8 }
  0x9d PF: > { %s12_s11 = sadd.s32 1, %s346_s11   ;;  %s402_s9 = smov %s342_s10 }
  0x9e   : > { %p9_p5 = scmp.ge.s32.totalorder %s12_s11, 4   ;;  %s403_s10 = smov %s405_s12 }
  0xa0   :  { %11 = sbr.rel (!%p9_p5) target bundleno = 2 (0x2), region = 58 }

</bundles_post_ra>
